<compile_context>
chip_gen: v7x
topology: tpu7x:2x2x1
jax: 0.10.0
libtpu: 0.0.40
codegen_flags: <defaults>
</compile_context>

<pallas_src>
import functools
import math

import jax
import jax.numpy as jnp
from jax.experimental import pallas as pl
from jax.experimental.pallas import tpu as pltpu


def _round_up(x, m):
    return (x + m - 1) // m * m


# ----------------------------------------------------------------------------
# Pallas kernel: fused multi-layer  y_l = relu(x_{l-1} @ W_l + b_l)
# (1x1 conv + folded BN + ReLU stack) with optional fused max-pool over groups
# of `pool_n` consecutive rows at the end.
# ----------------------------------------------------------------------------
def _fused_mlp_kernel(*refs, num_layers, relu_last, pool_n):
    x_ref = refs[0]
    o_ref = refs[-1]
    h = x_ref[...]                                   # [tm, Cin] bf16
    for li in range(num_layers):
        w = refs[1 + 2 * li][...]                    # [Cin_l, Cout_l] bf16 (BN scale folded)
        b = refs[2 + 2 * li][...]                    # [1, Cout_l] f32
        y = jnp.dot(h, w, preferred_element_type=jnp.float32)   # f32 accumulate on MXU
        y = y + b
        if relu_last or li < num_layers - 1:
            y = jnp.maximum(y, 0.0)
        # Keep the live intermediate in bf16 (next matmul consumes bf16 anyway)
        h = y.astype(jnp.bfloat16) if li < num_layers - 1 else y
    if pool_n > 1:
        rows, c = h.shape
        # Splits the sublane axis and reduces over it (XLU sublane max);
        # no lane relayout is needed.
        h = jnp.max(h.reshape(rows // pool_n, pool_n, c), axis=1)
    o_ref[...] = h.astype(o_ref.dtype)


def fused_mlp(x, layers, *, relu_last=True, pool=None, tm=1024,
              out_dtype=jnp.bfloat16):
    """x: [..., Cin]; layers: list of (w_bf16 [Cin,Cout], bias_f32 [1,Cout]).

    If `pool` is an int, the second-to-last input axis is the group axis of
    size `pool` and the kernel max-pools over it (output drops that axis).
    """
    lead = x.shape[:-1]
    cin = x.shape[-1]
    x2 = x.reshape(-1, cin)
    if x2.dtype != jnp.bfloat16:
        x2 = x2.astype(jnp.bfloat16)
    m = x2.shape[0]

    pool_n = int(pool) if pool else 1
    if pool_n > 1:
        assert lead[-1] == pool_n, (lead, pool_n)
    # Padding rows of a partial tile must form whole groups so their pooled
    # outputs land out of bounds and are dropped.
    assert m % pool_n == 0, (m, pool_n)

    # Row granularity: 16 * pool_n keeps bf16 input blocks AND pooled bf16
    # output blocks on (16, 128)-aligned row counts.
    unit = 16 * pool_n
    if m > unit:
        # Big tiles for DMA/step-overhead efficiency, but never more than half
        # the rows per tile so grid >= 2 and both v7x TensorCores get work.
        half = _round_up(-(-m // 2), unit)
        tm_eff = min(_round_up(tm, unit), half)
    else:
        tm_eff = _round_up(m, unit)
    grid = pl.cdiv(m, tm_eff)
    m_out = m // pool_n
    rows_out = tm_eff // pool_n
    cout = layers[-1][0].shape[1]

    in_specs = [pl.BlockSpec((tm_eff, cin), lambda i: (i, 0))]
    args = [x2]
    for w, b in layers:
        kdim, ndim = w.shape
        in_specs.append(pl.BlockSpec((kdim, ndim), lambda i: (0, 0)))
        in_specs.append(pl.BlockSpec((1, ndim), lambda i: (0, 0)))
        args.append(w)
        args.append(b)

    out = pl.pallas_call(
        functools.partial(_fused_mlp_kernel, num_layers=len(layers),
                          relu_last=relu_last, pool_n=pool_n),
        out_shape=jax.ShapeDtypeStruct((m_out, cout), out_dtype),
        grid_spec=pltpu.PrefetchScalarGridSpec(
            num_scalar_prefetch=0,
            grid=(grid,),
            in_specs=in_specs,
            out_specs=pl.BlockSpec((rows_out, cout), lambda i: (i, 0)),
        ),
        compiler_params=pltpu.CompilerParams(
            dimension_semantics=("parallel",)),
    )(*args)

    if pool_n > 1:
        return out.reshape(lead[:-1] + (cout,))
    return out.reshape(lead + (cout,))


# ----------------------------------------------------------------------------
# Point-cloud utilities (glue; stays in plain JAX)
# ----------------------------------------------------------------------------
def square_distance(src, dst):
    # src [B,N,3], dst [B,M,3] -> [B,N,M]
    d = -2.0 * jnp.einsum('bnc,bmc->bnm', src, dst)
    d = d + jnp.sum(src * src, -1)[:, :, None]
    d = d + jnp.sum(dst * dst, -1)[:, None, :]
    return d


def index_points(points, idx):
    # points [B,N,C], idx [B,...] -> [B,...,C]
    return jax.vmap(lambda p, i: p[i])(points, idx)


def knn_indices(k, query, database):
    # indices into `database` of the k nearest points for each `query` point
    d = square_distance(query, database)
    _, idx = jax.lax.top_k(-d, k)
    return idx


def farthest_point_sample(xyz, npoint):
    # xyz [B,N,3] -> idx [B,npoint]  (deterministic: starts from index 0)
    B, N, _ = xyz.shape

    def body(i, state):
        centroids, distance, farthest = state
        centroids = centroids.at[:, i].set(farthest)
        centroid = jnp.take_along_axis(xyz, farthest[:, None, None], axis=1)
        dist = jnp.sum((xyz - centroid) ** 2, -1)
        distance = jnp.minimum(distance, dist)
        farthest = jnp.argmax(distance, -1).astype(jnp.int32)
        return centroids, distance, farthest

    init = (jnp.zeros((B, npoint), jnp.int32),
            jnp.full((B, N), 1e10, jnp.float32),
            jnp.zeros((B,), jnp.int32))
    centroids, _, _ = jax.lax.fori_loop(0, npoint, body, init)
    return centroids


def query_ball_point(radius, nsample, xyz, new_xyz):
    # xyz [B,N,3], new_xyz [B,S,3] -> idx [B,S,nsample]
    B, N, _ = xyz.shape
    S = new_xyz.shape[1]
    sqrdists = square_distance(new_xyz, xyz)
    arange = jnp.broadcast_to(jnp.arange(N, dtype=jnp.int32), (B, S, N))
    group_idx = jnp.where(sqrdists > radius ** 2, N, arange)
    group_idx = jnp.sort(group_idx, axis=-1)[:, :, :nsample]
    group_first = jnp.broadcast_to(group_idx[:, :, :1], group_idx.shape)
    group_idx = jnp.where(group_idx == N, group_first, group_idx)
    return group_idx


# ----------------------------------------------------------------------------
# FlowNet3D building blocks (grouping in f32 geometry, MLP slabs built in bf16)
# ----------------------------------------------------------------------------
def set_abstraction(layers, xyz, feat, npoint, radius, nsample, tm=2048):
    # xyz [B,N,3], feat [B,N,D] -> new_xyz [B,S,3], new_feat [B,S,mlp[-1]]
    fps_idx = farthest_point_sample(xyz, npoint)
    new_xyz = index_points(xyz, fps_idx)
    idx = query_ball_point(radius, nsample, xyz, new_xyz)
    grouped_xyz = index_points(xyz, idx) - new_xyz[:, :, None, :]
    grouped_feat = index_points(feat, idx)
    new_points = jnp.concatenate([grouped_xyz.astype(jnp.bfloat16),
                                  grouped_feat.astype(jnp.bfloat16)], axis=-1)
    new_feat = fused_mlp(new_points, layers, pool=nsample, tm=tm)  # MLP + max fused
    return new_xyz, new_feat


def flow_embedding(layers, pos1, pos2, feat1, feat2, nsample):
    # corr_func == 'concat', pooling == 'max', knn grouping
    idx = knn_indices(nsample, pos1, pos2)              # into pos2
    pos2_g = index_points(pos2, idx)
    pos_diff = (pos2_g - pos1[:, :, None, :]).astype(jnp.bfloat16)
    feat2_g = index_points(feat2.astype(jnp.bfloat16), idx)
    feat1_e = jnp.broadcast_to(feat1.astype(jnp.bfloat16)[:, :, None, :],
                               feat2_g.shape)
    new = jnp.concatenate([pos_diff, feat2_g, feat1_e], axis=-1)
    return pos1, fused_mlp(new, layers, pool=nsample, tm=2048)


def set_upconv(mlp1, mlp2, pos1, pos2, feat1, feat2, nsample):
    # pos1 dense [B,N1,3], pos2 sparse [B,N2,3]
    idx = knn_indices(nsample, pos1, pos2)              # into pos2
    pos2_g = index_points(pos2, idx)
    pos_diff = (pos2_g - pos1[:, :, None, :]).astype(jnp.bfloat16)
    feat2_g = index_points(feat2.astype(jnp.bfloat16), idx)
    feat_new = jnp.concatenate([feat2_g, pos_diff], axis=-1)
    if mlp1:
        feat_new = fused_mlp(feat_new, mlp1, pool=nsample)   # MLP + max fused
    else:
        feat_new = jnp.max(feat_new, axis=2)
    feat_new = jnp.concatenate([feat_new, feat1.astype(jnp.bfloat16)], axis=-1)
    if mlp2:
        feat_new = fused_mlp(feat_new, mlp2)
    return feat_new


def feature_propagation(layers, pos1, pos2, feat1, feat2):
    d = square_distance(pos1, pos2)
    neg, idx = jax.lax.top_k(-d, 3)
    dists = jnp.maximum(-neg, 1e-10)
    weight = 1.0 / dists
    weight = weight / jnp.sum(weight, -1, keepdims=True)
    grouped = index_points(feat2, idx).astype(jnp.float32)   # [B,N,3,C2]
    interp = jnp.sum(grouped * weight[..., None], axis=2)    # f32 interpolation
    feat_new = jnp.concatenate([interp.astype(jnp.bfloat16),
                                feat1.astype(jnp.bfloat16)], axis=-1)
    return fused_mlp(feat_new, layers)


# ----------------------------------------------------------------------------
# Parameter construction (deterministic, synthetic). BN scale folded into W,
# weights pre-cast to bf16 once. conv2 output is zero-padded to 128 channels
# so the head kernel's store is lane-dense; the wrapper slices [:, :3].
# ----------------------------------------------------------------------------
HEAD_COUT = 3
HEAD_COUT_PAD = 128


def make_layer(key, cin, cout, bn=True, conv_bias=False):
    k1, k2, k3, k4, k5, k6 = jax.random.split(key, 6)
    w = jax.random.normal(k1, (cin, cout), jnp.float32) / math.sqrt(cin)
    if bn:
        gamma = 1.0 + 0.1 * jax.random.normal(k2, (cout,), jnp.float32)
        beta = 0.1 * jax.random.normal(k3, (cout,), jnp.float32)
        mean = 0.1 * jax.random.normal(k4, (cout,), jnp.float32)
        var = 1.0 + 0.1 * jax.random.uniform(k5, (cout,), jnp.float32)
        scale = gamma * jax.lax.rsqrt(var + 1e-5)
        bias = beta - mean * scale
    else:
        scale = jnp.ones((cout,), jnp.float32)
        bias = jnp.zeros((cout,), jnp.float32)
    if conv_bias:
        bias = bias + 0.05 * jax.random.normal(k6, (cout,), jnp.float32)
    w_folded = (w * scale[None, :]).astype(jnp.bfloat16)
    return (w_folded, bias.reshape(1, cout).astype(jnp.float32))


def pad_layer_cout(layer, cout_pad):
    w, b = layer
    cout = w.shape[1]
    w_p = jnp.zeros((w.shape[0], cout_pad), w.dtype).at[:, :cout].set(w)
    b_p = jnp.zeros((1, cout_pad), b.dtype).at[:, :cout].set(b)
    return (w_p, b_p)


def make_mlp(key, channels, bn=True):
    keys = jax.random.split(key, max(len(channels) - 1, 1))
    return [make_layer(keys[i], channels[i], channels[i + 1], bn=bn)
            for i in range(len(channels) - 1)]


def init_params(key):
    ks = jax.random.split(key, 13)
    p = {}
    p['sa1'] = make_mlp(ks[0], [3 + 3, 32, 32, 64])
    p['sa2'] = make_mlp(ks[1], [64 + 3, 64, 64, 128])
    p['sa3'] = make_mlp(ks[2], [128 + 3, 128, 128, 256])
    p['sa4'] = make_mlp(ks[3], [256 + 3, 256, 256, 512])
    p['fe'] = make_mlp(ks[4], [2 * 128 + 3, 128, 128, 128])
    p['su1_mlp1'] = []                                          # mlp=[]
    p['su1_mlp2'] = make_mlp(ks[5], [512 + 3 + 256, 256, 256])  # 771 -> 256,256
    p['su2_mlp1'] = make_mlp(ks[6], [256 + 3, 128, 128, 256])
    p['su2_mlp2'] = make_mlp(ks[7], [256 + 256, 256])
    p['su3_mlp1'] = make_mlp(ks[8], [256 + 3, 128, 128, 256])
    p['su3_mlp2'] = make_mlp(ks[9], [256 + 64, 256])
    p['fp'] = make_mlp(ks[10], [256 + 3, 256, 256])
    p['conv1'] = make_layer(ks[11], 256, 128, bn=True, conv_bias=False)
    # conv2: real Cout=3, padded with zero columns to 128 for a lane-dense store
    p['conv2'] = pad_layer_cout(
        make_layer(ks[12], 128, HEAD_COUT, bn=False, conv_bias=True),
        HEAD_COUT_PAD)
    return p


# ----------------------------------------------------------------------------
# JGWTF forward
# ----------------------------------------------------------------------------
def sceneflow_estimate(p, pc1, pc2, feat1, feat2):
    # all channels-last: pc* [B,N,3], feat* [B,N,3]; returns sf [B,N,3] (f32)
    N = pc1.shape[1]
    l1_pc1, l1_f1 = set_abstraction(p['sa1'], pc1, feat1, N // 2, 0.5, 16)
    l2_pc1, l2_f1 = set_abstraction(p['sa2'], l1_pc1, l1_f1, N // 8, 1.0, 16)
    l1_pc2, l1_f2 = set_abstraction(p['sa1'], pc2, feat2, N // 2, 0.5, 16)
    l2_pc2, l2_f2 = set_abstraction(p['sa2'], l1_pc2, l1_f2, N // 8, 1.0, 16)

    _, l2_f1_new = flow_embedding(p['fe'], l2_pc1, l2_pc2, l2_f1, l2_f2, 64)

    l3_pc1, l3_f1 = set_abstraction(p['sa3'], l2_pc1, l2_f1_new, N // 32, 2.0, 8)
    l4_pc1, l4_f1 = set_abstraction(p['sa4'], l3_pc1, l3_f1, N // 128, 4.0, 8)

    l3_fnew1 = set_upconv(p['su1_mlp1'], p['su1_mlp2'],
                          l3_pc1, l4_pc1, l3_f1, l4_f1, 8)
    l2_fnew1 = set_upconv(p['su2_mlp1'], p['su2_mlp2'],
                          l2_pc1, l3_pc1,
                          jnp.concatenate([l2_f1, l2_f1_new], axis=-1),
                          l3_fnew1, 8)
    l1_fnew1 = set_upconv(p['su3_mlp1'], p['su3_mlp2'],
                          l1_pc1, l2_pc1, l1_f1, l2_fnew1, 8)
    l0_fnew1 = feature_propagation(p['fp'], pc1, l1_pc1, feat1, l1_fnew1)

    # Head: conv1 + bn1 + relu, then conv2 (+bias, no act) fused in one kernel.
    # conv2 is padded to 128 lanes (zero cols) -> unmasked stores; slice to 3.
    head = fused_mlp(l0_fnew1, [p['conv1'], p['conv2']],
                     relu_last=False, out_dtype=jnp.float32)
    return head[..., :HEAD_COUT]


def jgwtf_forward(p, pc1, pc2, feature1, feature2, state='train'):
    # inputs: PyTorch layout [B, 3, N]
    pc1_t = jnp.transpose(pc1, (0, 2, 1))
    pc2_t = jnp.transpose(pc2, (0, 2, 1))
    f1_t = jnp.transpose(feature1, (0, 2, 1))
    f2_t = jnp.transpose(feature2, (0, 2, 1))

    sf_f = sceneflow_estimate(p, pc1_t, pc2_t, f1_t, f2_t)   # [B,N,3]
    sf_f_out = jnp.transpose(sf_f, (0, 2, 1))                # [B,3,N]
    if state == 'test':
        return sf_f_out

    pc1_warp = pc1_t + sf_f                                  # [B,N,3]
    # idx = knn_point(1, pc1_warp, pc2): nearest pc1_warp point for each pc2 point
    idx = knn_indices(1, pc2_t, pc1_warp)                    # [B,N,1]
    B, N, _ = pc1_warp.shape
    idx3 = jnp.broadcast_to(idx, (B, N, 3))
    pc1_anchor = (pc1_warp + jnp.take_along_axis(pc2_t, idx3, axis=1)) / 2.0
    ft1_anchor = (f1_t + jnp.take_along_axis(f2_t, idx3, axis=1)) / 2.0

    sf_b = sceneflow_estimate(p, pc1_anchor, pc1_t, ft1_anchor, f1_t)
    return sf_f_out, jnp.transpose(sf_b, (0, 2, 1))


# ----------------------------------------------------------------------------
# Plain-JAX reference of one fused_mlp stack (same bf16/f32-acc math) used as
# an in-script correctness check of the Pallas kernel.
# ----------------------------------------------------------------------------
def _mlp_reference(x, layers, relu_last=True, pool=None):
    h = x.reshape(-1, x.shape[-1]).astype(jnp.bfloat16)
    for li, (w, b) in enumerate(layers):
        y = jnp.dot(h, w, preferred_element_type=jnp.float32) + b
        if relu_last or li < len(layers) - 1:
            y = jnp.maximum(y, 0.0)
        h = y.astype(jnp.bfloat16) if li < len(layers) - 1 else y
    if pool:
        h = jnp.max(h.reshape(-1, pool, h.shape[-1]), axis=1)
    return h.astype(jnp.float32)


# ----------------------------------------------------------------------------
if __name__ == "__main__":
    B, N = 2, 1024   # N must be divisible by 128 (sa4 uses N/128 centroids)
    key = jax.random.PRNGKey(0)
    k_param, k1, k2, k3, k4, k5 = jax.random.split(key, 6)

    params = init_params(k_param)

    # Unit check: fused Pallas MLP (+pool) vs plain-JAX reference (same math).
    xtest = jax.random.normal(k5, (2, 16, 16, 6), jnp.float32)
    got = fused_mlp(xtest, params['sa1'], pool=16).astype(jnp.float32)
    ref = _mlp_reference(xtest, params['sa1'], pool=16).reshape(got.shape)
    assert bool(jnp.allclose(got, ref, rtol=5e-2, atol=5e-2)), "fused_mlp mismatch"

    pc1 = jax.random.normal(k1, (B, 3, N), jnp.float32)
    pc2 = pc1 + 0.05 * jax.random.normal(k2, (B, 3, N), jnp.float32)
    feature1 = jax.random.normal(k3, (B, 3, N), jnp.float32)
    feature2 = jax.random.normal(k4, (B, 3, N), jnp.float32)

    fwd = jax.jit(functools.partial(jgwtf_forward, state='train'))
    sf_f, sf_b = fwd(params, pc1, pc2, feature1, feature2)
    jax.block_until_ready((sf_f, sf_b))

    assert sf_f.shape == (B, 3, N) and sf_b.shape == (B, 3, N)
    assert bool(jnp.all(jnp.isfinite(sf_f))) and bool(jnp.all(jnp.isfinite(sf_b)))
    print("KERNEL_OK")
</pallas_src>

<mosaic_0001>
module attributes {stable_mosaic.version = 11 : i64} {
  func.func @_fused_mlp_kernel(%arg0: i32, %arg1: memref<256x6xbf16, #tpu.memory_space<vmem>>, %arg2: memref<6x32xbf16, #tpu.memory_space<vmem>>, %arg3: memref<1x32xf32, #tpu.memory_space<vmem>>, %arg4: memref<32x32xbf16, #tpu.memory_space<vmem>>, %arg5: memref<1x32xf32, #tpu.memory_space<vmem>>, %arg6: memref<32x64xbf16, #tpu.memory_space<vmem>>, %arg7: memref<1x64xf32, #tpu.memory_space<vmem>>, %arg8: memref<16x64xbf16, #tpu.memory_space<vmem>>) attributes {dimension_semantics = [#tpu.dimension_semantics<parallel>], iteration_bounds = array<i64: 2>, scalar_prefetch = 0 : i64, scratch_operands = 0 : i64, tpu.core_type = #tpu.core_type<tc>, window_params = [{transform_indices = @transform_0, window_bounds = array<i64: 256, 6>}, {pipeline_mode = #tpu.pipeline_mode<synchronous>, transform_indices = @transform_1, window_bounds = array<i64: 6, 32>}, {pipeline_mode = #tpu.pipeline_mode<synchronous>, transform_indices = @transform_2, window_bounds = array<i64: 1, 32>}, {pipeline_mode = #tpu.pipeline_mode<synchronous>, transform_indices = @transform_3, window_bounds = array<i64: 32, 32>}, {pipeline_mode = #tpu.pipeline_mode<synchronous>, transform_indices = @transform_4, window_bounds = array<i64: 1, 32>}, {pipeline_mode = #tpu.pipeline_mode<synchronous>, transform_indices = @transform_5, window_bounds = array<i64: 32, 64>}, {pipeline_mode = #tpu.pipeline_mode<synchronous>, transform_indices = @transform_6, window_bounds = array<i64: 1, 64>}, {transform_indices = @transform_7, window_bounds = array<i64: 16, 64>}]} {
    %c0 = arith.constant 0 : index
    %c0_0 = arith.constant 0 : index
    %0 = vector.load %arg1[%c0, %c0_0] : memref<256x6xbf16, #tpu.memory_space<vmem>>, vector<256x6xbf16>
    %c0_1 = arith.constant 0 : index
    %c0_2 = arith.constant 0 : index
    %1 = vector.load %arg2[%c0_1, %c0_2] : memref<6x32xbf16, #tpu.memory_space<vmem>>, vector<6x32xbf16>
    %c0_3 = arith.constant 0 : index
    %c0_4 = arith.constant 0 : index
    %2 = vector.load %arg3[%c0_3, %c0_4] : memref<1x32xf32, #tpu.memory_space<vmem>>, vector<1x32xf32>
    %cst = arith.constant dense<0.000000e+00> : vector<256x32xf32>
    %3 = tpu.matmul %0, %1, %cst {dimension_numbers = #tpu.dot_dimension_numbers<[1], [0], [0], [1], [0, 0, 1, 1], [], []>} : vector<256x6xbf16>, vector<6x32xbf16>, vector<256x32xf32> -> vector<256x32xf32>
    %4 = vector.broadcast %2 : vector<1x32xf32> to vector<256x32xf32>
    %5 = arith.addf %3, %4 : vector<256x32xf32>
    %cst_5 = arith.constant 0.000000e+00 : f32
    %6 = vector.broadcast %cst_5 : f32 to vector<256x32xf32>
    %7 = arith.maximumf %5, %6 : vector<256x32xf32>
    %8 = arith.truncf %7 : vector<256x32xf32> to vector<256x32xbf16>
    %c0_6 = arith.constant 0 : index
    %c0_7 = arith.constant 0 : index
    %9 = vector.load %arg4[%c0_6, %c0_7] : memref<32x32xbf16, #tpu.memory_space<vmem>>, vector<32x32xbf16>
    %c0_8 = arith.constant 0 : index
    %c0_9 = arith.constant 0 : index
    %10 = vector.load %arg5[%c0_8, %c0_9] : memref<1x32xf32, #tpu.memory_space<vmem>>, vector<1x32xf32>
    %cst_10 = arith.constant dense<0.000000e+00> : vector<256x32xf32>
    %11 = tpu.matmul %8, %9, %cst_10 {dimension_numbers = #tpu.dot_dimension_numbers<[1], [0], [0], [1], [0, 0, 1, 1], [], []>} : vector<256x32xbf16>, vector<32x32xbf16>, vector<256x32xf32> -> vector<256x32xf32>
    %12 = vector.broadcast %10 : vector<1x32xf32> to vector<256x32xf32>
    %13 = arith.addf %11, %12 : vector<256x32xf32>
    %cst_11 = arith.constant 0.000000e+00 : f32
    %14 = vector.broadcast %cst_11 : f32 to vector<256x32xf32>
    %15 = arith.maximumf %13, %14 : vector<256x32xf32>
    %16 = arith.truncf %15 : vector<256x32xf32> to vector<256x32xbf16>
    %c0_12 = arith.constant 0 : index
    %c0_13 = arith.constant 0 : index
    %17 = vector.load %arg6[%c0_12, %c0_13] : memref<32x64xbf16, #tpu.memory_space<vmem>>, vector<32x64xbf16>
    %c0_14 = arith.constant 0 : index
    %c0_15 = arith.constant 0 : index
    %18 = vector.load %arg7[%c0_14, %c0_15] : memref<1x64xf32, #tpu.memory_space<vmem>>, vector<1x64xf32>
    %cst_16 = arith.constant dense<0.000000e+00> : vector<256x64xf32>
    %19 = tpu.matmul %16, %17, %cst_16 {dimension_numbers = #tpu.dot_dimension_numbers<[1], [0], [0], [1], [0, 0, 1, 1], [], []>} : vector<256x32xbf16>, vector<32x64xbf16>, vector<256x64xf32> -> vector<256x64xf32>
    %20 = vector.broadcast %18 : vector<1x64xf32> to vector<256x64xf32>
    %21 = arith.addf %19, %20 : vector<256x64xf32>
    %cst_17 = arith.constant 0.000000e+00 : f32
    %22 = vector.broadcast %cst_17 : f32 to vector<256x64xf32>
    %23 = arith.maximumf %21, %22 : vector<256x64xf32>
    %24 = vector.shape_cast %23 : vector<256x64xf32> to vector<16x16x64xf32>
    %cst_18 = arith.constant dense<0xFF800000> : vector<16x64xf32>
    %25 = vector.multi_reduction <maximumf>, %24, %cst_18 [1] : vector<16x16x64xf32> to vector<16x64xf32>
    %26 = arith.truncf %25 : vector<16x64xf32> to vector<16x64xbf16>
    %c0_19 = arith.constant 0 : index
    %c0_20 = arith.constant 0 : index
    %27 = vector.load %arg8[%c0_19, %c0_20] : memref<16x64xbf16, #tpu.memory_space<vmem>>, vector<16x64xbf16>
    tpu.vector_store %arg8[%c0_19, %c0_20], %26 {strides = array<i32>} : memref<16x64xbf16, #tpu.memory_space<vmem>>, vector<16x64xbf16>,
    return
  }
  func.func @transform_0(%arg0: i32) -> (i32, i32) {
    %c0_i32 = arith.constant 0 : i32
    %c0_i32_0 = arith.constant 0 : i32
    return %arg0, %c0_i32 : i32, i32
  }
  func.func @transform_1(%arg0: i32) -> (i32, i32) {
    %c0_i32 = arith.constant 0 : i32
    %c0_i32_0 = arith.constant 0 : i32
    %c0_i32_1 = arith.constant 0 : i32
    return %c0_i32, %c0_i32_0 : i32, i32
  }
  func.func @transform_2(%arg0: i32) -> (i32, i32) {
    %c0_i32 = arith.constant 0 : i32
    %c0_i32_0 = arith.constant 0 : i32
    %c0_i32_1 = arith.constant 0 : i32
    return %c0_i32, %c0_i32_0 : i32, i32
  }
  func.func @transform_3(%arg0: i32) -> (i32, i32) {
    %c0_i32 = arith.constant 0 : i32
    %c0_i32_0 = arith.constant 0 : i32
    %c0_i32_1 = arith.constant 0 : i32
    return %c0_i32, %c0_i32_0 : i32, i32
  }
  func.func @transform_4(%arg0: i32) -> (i32, i32) {
    %c0_i32 = arith.constant 0 : i32
    %c0_i32_0 = arith.constant 0 : i32
    %c0_i32_1 = arith.constant 0 : i32
    return %c0_i32, %c0_i32_0 : i32, i32
  }
  func.func @transform_5(%arg0: i32) -> (i32, i32) {
    %c0_i32 = arith.constant 0 : i32
    %c0_i32_0 = arith.constant 0 : i32
    %c0_i32_1 = arith.constant 0 : i32
    return %c0_i32, %c0_i32_0 : i32, i32
  }
  func.func @transform_6(%arg0: i32) -> (i32, i32) {
    %c0_i32 = arith.constant 0 : i32
    %c0_i32_0 = arith.constant 0 : i32
    %c0_i32_1 = arith.constant 0 : i32
    return %c0_i32, %c0_i32_0 : i32, i32
  }
  func.func @transform_7(%arg0: i32) -> (i32, i32) {
    %c0_i32 = arith.constant 0 : i32
    %c0_i32_0 = arith.constant 0 : i32
    return %arg0, %c0_i32 : i32, i32
  }
}

</mosaic_0001>

<bundles_post_ra>
// kernel: tpu_custom_call.1
= control target key start
LH: loop header
LB: loop body
LE: loop exit
PB: predicated region body
PF: predicated region fallthrough
CT: control target
= control target key end

     0   :  { %12 = vsyncpa [#allocation3], 0  ;;  %s2341_s0 = inlined_call_operand.vmem [shape: bf16[512,6], index: 0, kind: input, shape index: {}]   ;;  %s2342_s1 = inlined_call_operand.vmem [shape: bf16[6,32], index: 1, kind: input, shape index: {}]   ;;  %s2343_s2 = inlined_call_operand.vmem [shape: f32[1,32], index: 2, kind: input, shape index: {}]   ;;  %s2344_s3 = inlined_call_operand.vmem [shape: bf16[32,32], index: 3, kind: input, shape index: {}]   ;;  %s2345_s4 = inlined_call_operand.vmem [shape: f32[1,32], index: 4, kind: input, shape index: {}]   ;;  %s2346_s5 = inlined_call_operand.vmem [shape: bf16[32,64], index: 5, kind: input, shape index: {}]   ;;  %s2347_s6 = inlined_call_operand.vmem [shape: f32[1,64], index: 6, kind: input, shape index: {}]   ;;  %s2348_s7 = inlined_call_operand.hbm [shape: bf16[32,64], index: 7, kind: output, shape index: {}]  }
   0x1   :  { %14 = vsyncpa [#allocation3 + $0x1], 0  ;;  %s1984_s24 = smov 0   ;;  %s1986_s25 = smov 0  }
   0x2   :  { %s1988_s26 = smov 0   ;;  %s1990_s27 = smov 0  }
   0x3 LB: > { %s2005_s28 = sadd.s32 4294967295, %s1939_s27   ;;  %s1537_s29 = sadd.s32 4294967294, %s1939_s27   ;;  %s1939_s27 = sphi %s1990_s27, %s2354_s27   ;;  %s1935_s26 = sphi %s1988_s26, %s2353_s26   ;;  %s1931_s25 = sphi %s1986_s25, %s2352_s25   ;;  %s1927_s24 = sphi %s1984_s24, %s2351_s24  }
   0x4   : > { %s2009_s30 = sadd.s32 1, %s1939_s27   ;;  %s179_s8 = sadd.s32 1, %s1935_s26 }
   0x5   : > { %s176_s9 = ssub.s32 %s1939_s27, %s2009_s30  ;;  %p189_p0 = scmp.ne.s32.totalorder %s1935_s26, %s1931_s25 }
   0x6   : > { %p177_p1 = scmp.eq.s32.totalorder %s176_s9, 0  ;;  %p190_p2 = scmp.eq.s32.totalorder %s2005_s28, 1 }
   0x7   : > { %p195_p3 = scmp.ne.s32.totalorder %s1931_s25, %s1927_s24  ;;  %p196_p4 = scmp.eq.s32.totalorder %s1537_s29, 1 }
   0x8   : > { %s2020_s10 = scalar_select %p177_p1, %s1935_s26, %s179_s8  }
   0x9   : > { %p2022_p5 = por %p190_p2, %p189_p0  ;;  %p2026_p6 = por %p196_p4, %p195_p3 }
   0xa   : > { %p1540_p7 = scmp.ge.s32.totalorder %s1939_s27, 1  ;;  %p241_p8 = scmp.lt.s32.totalorder %s1939_s27, 3 }
   0xc   : > { %p242_p9 = pnand %p1540_p7, %p241_p8 }
   0xd   : > { %v313_v0 = vld [vmem:[%s2342_s1] sm:$0x7] (!%p242_p9)  ;;  %vm450_vm0 = vcmask (!%p242_p9), 1042432   ;;  %s1542_s15 = sshll.u32 (!%p242_p9), %s2005_s28, 5  ;;  %vm401_vm1 = vcmask (!%p242_p9), 48128   ;;  %v1874_v9 = vld [vmem:[%s2344_s3 + $0x8] sm:$0xff] (!%p242_p9)  }
   0xe   : > { %245 = sbr.rel (%p242_p9) target bundleno = 785 (0x311), region = 48  ;;  %v1873_v1 = vld [vmem:[%s2344_s3] sm:$0xff] (!%p242_p9)   ;;  %1814 = vmatprep.subr.msk.bf16.mxu0 (!%p242_p9), %vm450_vm0, %v313_v0  ;;  %v452_v2 = vsel (!%p242_p9), %vm450_vm0, %v313_v0, 0  ;;  %p274_p10 = scmp.lt.s32.totalorder (!%p242_p9), %s1542_s15, 63  ;;  %1815 = vmatprep.subr.msk.bf16.mxu1 (!%p242_p9), %vm450_vm0, %v313_v0  ;;  %v1876_v21 = vld [vmem:[%s2346_s5 + $0x8] sm:$0xff] (!%p242_p9)   ;;  %vm686_vm2 = vcmask (!%p242_p9), 261120  }
   0xf   : > { %1707 = vmatpush3.bf16.msra.mxu0 (!%p242_p9), %v452_v2  ;;  %1813 = vmatpush3.bf16.msra.mxu1 (!%p242_p9), %v452_v2  ;;  %v1875_v20 = vld [vmem:[%s2346_s5] sm:$0xff] (!%p242_p9)   ;;  %vm1208_vm3 = vcmask (!%p242_p9), 523264   ;;  %vm1433_vm4 = vcmask (!%p242_p9), 1041409   ;;  %vm1435_vm5 = vcmask (!%p242_p9), 1042434   ;;  %vm1437_vm6 = vcmask (!%p242_p9), 1043459   ;;  %s270_s20 = sand.u32 (!%p242_p9), 1, %s1931_s25  }
  0x10   : > { %1740 = vmatprep.subr.bf16.mxu1 (!%p242_p9), %v1873_v1  ;;  %1776 = vmatprep.subr.bf16.mxu0 (!%p242_p9), %v1875_v20  ;;  %v2088_v22 = vld [vmem:[%s2343_s2] ss:$0 sm:$0xff] (!%p242_p9)  ;;  %vm1439_vm7 = vcmask (!%p242_p9), 1044484   ;;  %vm1441_vm8 = vcmask (!%p242_p9), 1045509   ;;  %vm1443_vm9 = vcmask (!%p242_p9), 1046534   ;;  %vm1445_vm10 = vcmask (!%p242_p9), 1047559  }
  0x11   : > { %vm1458_vm11 = vcmask (!%p242_p9), 519168   ;;  %s1652_s23 = sshll.u32 (!%p242_p9), %s2005_s28, 7  ;;  %s2300_s28 = scalar_lea.sflag (!%p242_p9), [#allocation3], %s270_s20 }
  0x12   : > { %s2292_s13 = scalar_lea.hbm (!%p242_p9), %s2348_s7, %s1652_s23 }
  0x15   : > { %s2356_s15 = smov (!%p274_p10, %s1542_s15), 63 }
  0x16   : > { %s1543_s18 = sshll.u32 %s2356_s15, 2  ;;  %s1941_s15 = smov [#allocation2]  }
  0x17   : > { %s2042_s21 = scalar_lea.vmem %s2341_s0, %s1543_s18  ;;  %s1881_s16 = sshll.u32 %s1941_s15, 4  ;;  %s1882_s16 = int_to_ptr.vmem [resolvable:$false] %s1881_s16 }
  0x18   : > { %v1857_v3 = vld [vmem:[%s2042_s21] sm:$0xff]   ;;  %v1858_v4 = vld [vmem:[%s2042_s21 + $0x8] sm:$0xff]   ;;  %v1859_v5 = vld [vmem:[%s2042_s21 + $0x10] sm:$0xff]   ;;  %s1883_s17 = scalar_lea.vmem %s1882_s16, 256 }
  0x19   : > { %1708 = vmatprep.mubr.msk.bf16.mxu0 %vm401_vm1, %v1857_v3  ;;  %v1860_v6 = vld [vmem:[%s2042_s21 + $0x18] sm:$0xff]   ;;  %v1861_v7 = vld [vmem:[%s2042_s21 + $0x20] sm:$0xff]   ;;  %v1866_v10 = vld [vmem:[%s2042_s21 + $0x48] sm:$0xff]  }
  0x1a   : > { %1709 = vmatmul.mubr.msk.bf16.vlgmr.msra.gmra.mrb[0].mxu0 %vm401_vm1, %v1858_v4  ;;  %v1865_v8 = vld [vmem:[%s2042_s21 + $0x40] sm:$0xff]   ;;  %v1867_v11 = vld [vmem:[%s2042_s21 + $0x50] sm:$0xff]   ;;  %v1862_v12 = vld [vmem:[%s2042_s21 + $0x28] sm:$0xff]  }
  0x1b   : > { %1712 = vmatprep.mubr.msk.bf16.mxu0 %vm401_vm1, %v1859_v5  ;;  %1724 = vmatprep.mubr.msk.bf16.mxu1 %vm401_vm1, %v1865_v8  ;;  %v1868_v13 = vld [vmem:[%s2042_s21 + $0x58] sm:$0xff]   ;;  %v1863_v14 = vld [vmem:[%s2042_s21 + $0x30] sm:$0xff]   ;;  %v1869_v15 = vld [vmem:[%s2042_s21 + $0x60] sm:$0xff]  }
  0x1c   : > { %1725 = vmatmul.mubr.msk.bf16.vlgmr.msra.gmra.mrb[0].mxu1 %vm401_vm1, %v1866_v10  ;;  %v1864_v16 = vld [vmem:[%s2042_s21 + $0x38] sm:$0xff]   ;;  %v1870_v17 = vld [vmem:[%s2042_s21 + $0x68] sm:$0xff]   ;;  %v1871_v18 = vld [vmem:[%s2042_s21 + $0x70] sm:$0xff]   ;;  %1777 = vmatpush3.bf16.msra.mxu0 %v1875_v20 }
  0x1d   : > { %1728 = vmatprep.mubr.msk.bf16.mxu1 %vm401_vm1, %v1867_v11  ;;  %1741 = vmatpush3.bf16.msra.mxu1 %v1873_v1  ;;  %v1872_v19 = vld [vmem:[%s2042_s21 + $0x78] sm:$0xff]   ;;  %s1541_s21 = sshll.u32 %s270_s20, 3 }
  0x1e   : > { %1742 = vmatprep.subr.bf16.mxu1 %v1874_v9  ;;  %1778 = vmatprep.subr.bf16.mxu0 %v1876_v21  ;;  %s2271_s22 = scalar_lea.vmem [#allocation2], %s1541_s21 }
  0x1f   : > { %s1475_s29 = sshll.u32 %s2271_s22, 4  ;;  %s2294_s29 = int_to_ptr.vmem [resolvable:$true] %s1475_s29 }
  0x20   : > { %1779 = vmatpush3.bf16.msra.mxu0 %v1876_v21  ;;  %s1877_s14 = scalar_lea.vmem %s2294_s29, 128  ;;  %p1884_p0 = scmp.lt.s32.totalorder %s2294_s29, %s1882_s16 }
  0x21   : > { %1743 = vmatpush3.bf16.msra.mxu1 %v1874_v9  ;;  %p1878_p11 = scmp.ne.s32.totalorder %s2294_s29, %s1877_s14  ;;  %p1885_p1 = scmp.lt.s32.totalorder %s1883_s17, %s1877_s14 }
  0x22   : > { %1713 = vmatmul.mubr.msk.bf16.gmra.mrb[4].mxu0 %vm401_vm1, %v1860_v6 }
  0x23   : > { %1716 = vmatprep.mubr.msk.bf16.mxu0 %vm401_vm1, %v1861_v7  ;;  %p1879_p12 = pnand %p1878_p11, %p2022_p5  ;;  %p1886_p2 = por %p1885_p1, %p1884_p0 }
  0x24   : > { %1729 = vmatmul.mubr.msk.bf16.gmra.mrb[4].mxu1 %vm401_vm1, %v1868_v13 }
  0x25   : > { %1732 = vmatprep.mubr.msk.bf16.mxu1 %vm401_vm1, %v1869_v15  ;;  %p1880_p13 = pneg %p1879_p12 }
  0x27   : > { %p1887_p3 = pnand %p1886_p2, %p1880_p13 }
  0x2a   : > { %1717 = vmatmul.mubr.msk.bf16.gmra.mrb[8].mxu0 %vm401_vm1, %v1862_v12 }
  0x2b   : > { %1720 = vmatprep.mubr.msk.bf16.mxu0 %vm401_vm1, %v1863_v14 }
  0x2c   : > { %1733 = vmatmul.mubr.msk.bf16.gmra.mrb[8].mxu1 %vm401_vm1, %v1870_v17 }
  0x2d   : > { %1736 = vmatprep.mubr.msk.bf16.mxu1 %vm401_vm1, %v1871_v18 }
  0x32   : > { %1721 = vmatmul.mubr.msk.bf16.gmra.mrb[12].mxu0 %vm401_vm1, %v1864_v16 }
  0x34   : > { %1737 = vmatmul.mubr.msk.bf16.gmra.mrb[12].mxu1 %vm401_vm1, %v1872_v19 }
  0xed   : > { %v1710_v23 = vpop.f32.mrb[0].mxu0 }
  0xee   : > { %v497_v24 = vadd.f32 %v1710_v23, %v2088_v22  ;;  %v488_v25 = vpop.f32.mrb[1].mxu0 }
  0xef   : > { %v489_v26 = vadd.f32 %v2088_v22, %v488_v25  ;;  %v1711_v27 = vpop.f32.mrb[2].mxu0  ;;  %v1726_v38 = vpop.f32.mrb[0].mxu1 }
  0xf0   : > { %v500_v28 = vadd.f32 %v1711_v27, %v2088_v22  ;;  %v491_v29 = vpop.f32.mrb[3].mxu0  ;;  %v617_v31 = vmax.f32 %v497_v24, 0.0  ;;  %v561_v41 = vadd.f32 %v1726_v38, %v2088_v22  ;;  %v552_v42 = vpop.f32.mrb[1].mxu1 }
  0xf1   : > { %v492_v30 = vadd.f32 %v2088_v22, %v491_v29  ;;  %v615_v33 = vmax.f32 %v489_v26, 0.0  ;;  %v553_v45 = vadd.f32 %v2088_v22, %v552_v42  ;;  %v1727_v46 = vpop.f32.mrb[2].mxu1 }
  0xf2   : > { %v618_v32 = vmax.f32 %v500_v28, 0.0  ;;  %v633_v49 = vmax.f32 %v561_v41, 0.0  ;;  %v564_v50 = vadd.f32 %v1727_v46, %v2088_v22  ;;  %v555_v51 = vpop.f32.mrb[3].mxu1 }
  0xf3   : > { %v616_v34 = vmax.f32 %v492_v30, 0.0  ;;  %v631_v53 = vmax.f32 %v553_v45, 0.0  ;;  %v556_v54 = vadd.f32 %v2088_v22, %v555_v51 }
  0xf4   : > { %v648_v35 = vpack.c.bf16 %v618_v32, %v617_v31  ;;  %v634_v57 = vmax.f32 %v564_v50, 0.0 }
  0xf5   : > { %v647_v36 = vpack.c.bf16 %v616_v34, %v615_v33  ;;  %v1714_v37 = vpop.f32.mrb[4].mxu0  ;;  %v632_v60 = vmax.f32 %v556_v54, 0.0 }
  0xf6   : > { %v513_v39 = vadd.f32 %v1714_v37, %v2088_v22  ;;  %v504_v40 = vpop.f32.mrb[5].mxu0  ;;  %v2104_v62 = vpack.c.bf16 %v634_v57, %v633_v49 }
  0xf7   : > { %v505_v43 = vadd.f32 %v2088_v22, %v504_v40  ;;  %v1715_v44 = vpop.f32.mrb[6].mxu0  ;;  %1744 = vmatprep.mubr.msk.bf16.mxu1 %vm686_vm2, %v647_v36  ;;  %v2106_v1 = vpack.c.bf16 %v632_v60, %v631_v53  ;;  %v1730_v2 = vpop.f32.mrb[4].mxu1 }
  0xf8   : > { %v516_v47 = vadd.f32 %v1715_v44, %v2088_v22  ;;  %v507_v48 = vpop.f32.mrb[7].mxu0  ;;  %1745 = vmatmul.mubr.msk.bf16.vlgmr.msra.gmra.mrb[16].mxu1 %vm686_vm2, %v648_v35  ;;  %v621_v55 = vmax.f32 %v513_v39, 0.0  ;;  %v577_v5 = vadd.f32 %v1730_v2, %v2088_v22  ;;  %v568_v6 = vpop.f32.mrb[5].mxu1 }
  0xf9   : > { %v508_v52 = vadd.f32 %v2088_v22, %v507_v48  ;;  %v619_v58 = vmax.f32 %v505_v43, 0.0  ;;  %v569_v9 = vadd.f32 %v2088_v22, %v568_v6  ;;  %v1731_v10 = vpop.f32.mrb[6].mxu1 }
  0xfa   : > { %v622_v56 = vmax.f32 %v516_v47, 0.0  ;;  %v637_v13 = vmax.f32 %v577_v5, 0.0  ;;  %v580_v14 = vadd.f32 %v1731_v10, %v2088_v22  ;;  %v571_v15 = vpop.f32.mrb[7].mxu1 }
  0xfb   : > { %v620_v59 = vmax.f32 %v508_v52, 0.0  ;;  %v635_v17 = vmax.f32 %v569_v9, 0.0  ;;  %v572_v18 = vadd.f32 %v2088_v22, %v571_v15 }
  0xfc   : > { %v650_v61 = vpack.c.bf16 %v622_v56, %v621_v55  ;;  %v638_v21 = vmax.f32 %v580_v14, 0.0 }
  0xfd   : > { %v649_v63 = vpack.c.bf16 %v620_v59, %v619_v58  ;;  %v1718_v0 = vpop.f32.mrb[8].mxu0  ;;  %v636_v25 = vmax.f32 %v572_v18, 0.0 }
  0xfe   : > { %v529_v3 = vadd.f32 %v1718_v0, %v2088_v22  ;;  %v520_v4 = vpop.f32.mrb[9].mxu0  ;;  %v658_v27 = vpack.c.bf16 %v638_v21, %v637_v13 }
  0xff   : > { %v521_v7 = vadd.f32 %v2088_v22, %v520_v4  ;;  %v1719_v8 = vpop.f32.mrb[10].mxu0  ;;  %1748 = vmatprep.mubr.msk.bf16.mxu1 %vm686_vm2, %v649_v63  ;;  %v657_v30 = vpack.c.bf16 %v636_v25, %v635_v17  ;;  %v1734_v31 = vpop.f32.mrb[8].mxu1 }
 0x100   : > { %v532_v11 = vadd.f32 %v1719_v8, %v2088_v22  ;;  %v523_v12 = vpop.f32.mrb[11].mxu0  ;;  %1749 = vmatmul.mubr.msk.bf16.gmra.mrb[20].mxu1 %vm686_vm2, %v650_v61  ;;  %v625_v19 = vmax.f32 %v529_v3, 0.0  ;;  %v593_v34 = vadd.f32 %v1734_v31, %v2088_v22  ;;  %v584_v35 = vpop.f32.mrb[9].mxu1 }
 0x101   : > { %v524_v16 = vadd.f32 %v2088_v22, %v523_v12  ;;  %v623_v23 = vmax.f32 %v521_v7, 0.0  ;;  %v585_v38 = vadd.f32 %v2088_v22, %v584_v35  ;;  %v1735_v39 = vpop.f32.mrb[10].mxu1 }
 0x102   : > { %v626_v20 = vmax.f32 %v532_v11, 0.0  ;;  %v641_v42 = vmax.f32 %v593_v34, 0.0  ;;  %v596_v43 = vadd.f32 %v1735_v39, %v2088_v22  ;;  %v587_v44 = vpop.f32.mrb[11].mxu1 }
 0x103   : > { %v624_v24 = vmax.f32 %v524_v16, 0.0  ;;  %v639_v46 = vmax.f32 %v585_v38, 0.0  ;;  %v588_v47 = vadd.f32 %v2088_v22, %v587_v44 }
 0x104   : > { %v652_v26 = vpack.c.bf16 %v626_v20, %v625_v19  ;;  %v642_v50 = vmax.f32 %v596_v43, 0.0 }
 0x105   : > { %v651_v28 = vpack.c.bf16 %v624_v24, %v623_v23  ;;  %v1722_v29 = vpop.f32.mrb[12].mxu0  ;;  %v640_v53 = vmax.f32 %v588_v47, 0.0 }
 0x106   : > { %v545_v32 = vadd.f32 %v1722_v29, %v2088_v22  ;;  %v536_v33 = vpop.f32.mrb[13].mxu0  ;;  %v660_v55 = vpack.c.bf16 %v642_v50, %v641_v42 }
 0x107   : > { %v537_v36 = vadd.f32 %v2088_v22, %v536_v33  ;;  %v1723_v37 = vpop.f32.mrb[14].mxu0  ;;  %1752 = vmatprep.mubr.msk.bf16.mxu1 %vm686_vm2, %v651_v28  ;;  %v659_v57 = vpack.c.bf16 %v640_v53, %v639_v46  ;;  %v1738_v58 = vpop.f32.mrb[12].mxu1 }
 0x108   : > { %v548_v40 = vadd.f32 %v1723_v37, %v2088_v22  ;;  %v539_v41 = vpop.f32.mrb[15].mxu0  ;;  %1753 = vmatmul.mubr.msk.bf16.gmra.mrb[24].mxu1 %vm686_vm2, %v652_v26  ;;  %v629_v48 = vmax.f32 %v545_v32, 0.0  ;;  %v609_v59 = vadd.f32 %v1738_v58, %v2088_v22  ;;  %v600_v60 = vpop.f32.mrb[13].mxu1 }
 0x109   : > { %v540_v45 = vadd.f32 %v2088_v22, %v539_v41  ;;  %v627_v51 = vmax.f32 %v537_v36, 0.0  ;;  %v601_v61 = vadd.f32 %v2088_v22, %v600_v60  ;;  %v1739_v63 = vpop.f32.mrb[14].mxu1 }
 0x10a   : > { %v630_v49 = vmax.f32 %v548_v40, 0.0  ;;  %v645_v0 = vmax.f32 %v609_v59, 0.0  ;;  %v612_v2 = vadd.f32 %v1739_v63, %v2088_v22  ;;  %v603_v3 = vpop.f32.mrb[15].mxu1 }
 0x10b   : > { %v628_v52 = vmax.f32 %v540_v45, 0.0  ;;  %v643_v4 = vmax.f32 %v601_v61, 0.0  ;;  %v604_v5 = vadd.f32 %v2088_v22, %v603_v3  ;;  %v2147_v22 = vld [vmem:[%s2345_s4] ss:$0 sm:$0xff] }
 0x10c   : > { %v654_v54 = vpack.c.bf16 %v630_v49, %v629_v48  ;;  %v646_v6 = vmax.f32 %v612_v2, 0.0 }
 0x10d   : > { %v653_v56 = vpack.c.bf16 %v628_v52, %v627_v51  ;;  %v644_v7 = vmax.f32 %v604_v5, 0.0 }
 0x10e   : > { %v662_v8 = vpack.c.bf16 %v646_v6, %v645_v0 }
 0x10f   : > { %1756 = vmatprep.mubr.msk.bf16.mxu1 %vm686_vm2, %v653_v56  ;;  %v661_v9 = vpack.c.bf16 %v644_v7, %v643_v4 }
 0x110   : > { %1757 = vmatmul.mubr.msk.bf16.gmra.mrb[28].mxu1 %vm686_vm2, %v654_v54 }
 0x111   : > { %1760 = vmatprep.mubr.msk.bf16.mxu1 %vm686_vm2, %v2106_v1 }
 0x118   : > { %1761 = vmatmul.mubr.msk.bf16.gmra.mrb[32].mxu1 %vm686_vm2, %v2104_v62 }
 0x119   : > { %1764 = vmatprep.mubr.msk.bf16.mxu1 %vm686_vm2, %v657_v30 }
 0x120   : > { %1765 = vmatmul.mubr.msk.bf16.gmra.mrb[36].mxu1 %vm686_vm2, %v658_v27 }
 0x121   : > { %1768 = vmatprep.mubr.msk.bf16.mxu1 %vm686_vm2, %v659_v57 }
 0x128   : > { %1769 = vmatmul.mubr.msk.bf16.gmra.mrb[40].mxu1 %vm686_vm2, %v660_v55 }
 0x129   : > { %1772 = vmatprep.mubr.msk.bf16.mxu1 %vm686_vm2, %v661_v9 }
 0x130   : > { %1773 = vmatmul.mubr.msk.bf16.gmra.mrb[44].mxu1 %vm686_vm2, %v662_v8 }
 0x1cb   : > { %v1746_v1 = vpop.f32.mrb[16].mxu1 }
 0x1cc   : > { %v778_v62 = vadd.f32 %v1746_v1, %v2147_v22  ;;  %v769_v10 = vpop.f32.mrb[17].mxu1 }
 0x1cd   : > { %v770_v11 = vadd.f32 %v2147_v22, %v769_v10  ;;  %v1747_v12 = vpop.f32.mrb[18].mxu1 }
 0x1ce   : > { %v781_v13 = vadd.f32 %v1747_v12, %v2147_v22  ;;  %v772_v14 = vpop.f32.mrb[19].mxu1  ;;  %v898_v16 = vmax.f32 %v778_v62, 0.0 }
 0x1cf   : > { %v773_v15 = vadd.f32 %v2147_v22, %v772_v14  ;;  %v896_v18 = vmax.f32 %v770_v11, 0.0 }
 0x1d0   : > { %v899_v17 = vmax.f32 %v781_v13, 0.0 }
 0x1d1   : > { %v897_v19 = vmax.f32 %v773_v15, 0.0 }
 0x1d2   : > { %v929_v20 = vpack.c.bf16 %v899_v17, %v898_v16 }
 0x1d3   : > { %v928_v21 = vpack.c.bf16 %v897_v19, %v896_v18  ;;  %v1750_v23 = vpop.f32.mrb[20].mxu1 }
 0x1d4   : > { %v794_v24 = vadd.f32 %v1750_v23, %v2147_v22  ;;  %v785_v25 = vpop.f32.mrb[21].mxu1 }
 0x1d5   : > { %v786_v26 = vadd.f32 %v2147_v22, %v785_v25  ;;  %v1751_v27 = vpop.f32.mrb[22].mxu1  ;;  %1780 = vmatprep.mubr.msk.bf16.mxu0 %vm686_vm2, %v928_v21 }
 0x1d6   : > { %v797_v28 = vadd.f32 %v1751_v27, %v2147_v22  ;;  %v788_v29 = vpop.f32.mrb[23].mxu1  ;;  %1781 = vmatmul.mubr.msk.bf16.vlgmr.msra.gmra.mrb[16].mxu0 %vm686_vm2, %v929_v20  ;;  %v902_v31 = vmax.f32 %v794_v24, 0.0 }
 0x1d7   : > { %v789_v30 = vadd.f32 %v2147_v22, %v788_v29  ;;  %v900_v33 = vmax.f32 %v786_v26, 0.0 }
 0x1d8   : > { %v903_v32 = vmax.f32 %v797_v28, 0.0 }
 0x1d9   : > { %v901_v34 = vmax.f32 %v789_v30, 0.0 }
 0x1da   : > { %v931_v35 = vpack.c.bf16 %v903_v32, %v902_v31 }
 0x1db   : > { %v930_v36 = vpack.c.bf16 %v901_v34, %v900_v33  ;;  %v1754_v37 = vpop.f32.mrb[24].mxu1 }
 0x1dc   : > { %v810_v38 = vadd.f32 %v1754_v37, %v2147_v22  ;;  %v801_v39 = vpop.f32.mrb[25].mxu1 }
 0x1dd   : > { %v802_v40 = vadd.f32 %v2147_v22, %v801_v39  ;;  %v1755_v41 = vpop.f32.mrb[26].mxu1  ;;  %1784 = vmatprep.mubr.msk.bf16.mxu0 %vm686_vm2, %v930_v36 }
 0x1de   : > { %v813_v42 = vadd.f32 %v1755_v41, %v2147_v22  ;;  %v804_v43 = vpop.f32.mrb[27].mxu1  ;;  %1785 = vmatmul.mubr.msk.bf16.gmra.mrb[20].mxu0 %vm686_vm2, %v931_v35  ;;  %v906_v45 = vmax.f32 %v810_v38, 0.0 }
 0x1df   : > { %v805_v44 = vadd.f32 %v2147_v22, %v804_v43  ;;  %v904_v47 = vmax.f32 %v802_v40, 0.0 }
 0x1e0   : > { %v907_v46 = vmax.f32 %v813_v42, 0.0 }
 0x1e1   : > { %v905_v48 = vmax.f32 %v805_v44, 0.0 }
 0x1e2   : > { %v933_v49 = vpack.c.bf16 %v907_v46, %v906_v45 }
 0x1e3   : > { %v932_v50 = vpack.c.bf16 %v905_v48, %v904_v47  ;;  %v1758_v51 = vpop.f32.mrb[28].mxu1 }
 0x1e4   : > { %v826_v52 = vadd.f32 %v1758_v51, %v2147_v22  ;;  %v817_v53 = vpop.f32.mrb[29].mxu1 }
 0x1e5   : > { %v818_v54 = vadd.f32 %v2147_v22, %v817_v53  ;;  %v1759_v55 = vpop.f32.mrb[30].mxu1  ;;  %1788 = vmatprep.mubr.msk.bf16.mxu0 %vm686_vm2, %v932_v50 }
 0x1e6   : > { %v829_v56 = vadd.f32 %v1759_v55, %v2147_v22  ;;  %v820_v57 = vpop.f32.mrb[31].mxu1  ;;  %1789 = vmatmul.mubr.msk.bf16.gmra.mrb[24].mxu0 %vm686_vm2, %v933_v49  ;;  %v910_v59 = vmax.f32 %v826_v52, 0.0 }
 0x1e7   : > { %v821_v58 = vadd.f32 %v2147_v22, %v820_v57  ;;  %v908_v61 = vmax.f32 %v818_v54, 0.0 }
 0x1e8   : > { %v911_v60 = vmax.f32 %v829_v56, 0.0 }
 0x1e9   : > { %v909_v63 = vmax.f32 %v821_v58, 0.0  ;;  %v2200_v58 = vld [vmem:[%s2347_s6] ss:$0 sm:$0xff] }
 0x1ea   : > { %v935_v0 = vpack.c.bf16 %v911_v60, %v910_v59 }
 0x1eb   : > { %v934_v2 = vpack.c.bf16 %v909_v63, %v908_v61  ;;  %v1762_v3 = vpop.f32.mrb[32].mxu1 }
 0x1ec   : > { %v842_v4 = vadd.f32 %v1762_v3, %v2147_v22  ;;  %v833_v5 = vpop.f32.mrb[33].mxu1 }
 0x1ed   : > { %v834_v6 = vadd.f32 %v2147_v22, %v833_v5  ;;  %v1763_v7 = vpop.f32.mrb[34].mxu1  ;;  %1792 = vmatprep.mubr.msk.bf16.mxu0 %vm686_vm2, %v934_v2 }
 0x1ee   : > { %v845_v8 = vadd.f32 %v1763_v7, %v2147_v22  ;;  %v836_v9 = vpop.f32.mrb[35].mxu1  ;;  %1793 = vmatmul.mubr.msk.bf16.gmra.mrb[28].mxu0 %vm686_vm2, %v935_v0  ;;  %v914_v62 = vmax.f32 %v842_v4, 0.0 }
 0x1ef   : > { %v837_v1 = vadd.f32 %v2147_v22, %v836_v9  ;;  %v912_v11 = vmax.f32 %v834_v6, 0.0 }
 0x1f0   : > { %v915_v10 = vmax.f32 %v845_v8, 0.0 }
 0x1f1   : > { %v913_v12 = vmax.f32 %v837_v1, 0.0 }
 0x1f2   : > { %v937_v13 = vpack.c.bf16 %v915_v10, %v914_v62 }
 0x1f3   : > { %v936_v14 = vpack.c.bf16 %v913_v12, %v912_v11  ;;  %v1766_v15 = vpop.f32.mrb[36].mxu1 }
 0x1f4   : > { %v858_v16 = vadd.f32 %v1766_v15, %v2147_v22  ;;  %v849_v17 = vpop.f32.mrb[37].mxu1 }
 0x1f5   : > { %v850_v18 = vadd.f32 %v2147_v22, %v849_v17  ;;  %v1767_v19 = vpop.f32.mrb[38].mxu1  ;;  %1796 = vmatprep.mubr.msk.bf16.mxu0 %vm686_vm2, %v936_v14 }
 0x1f6   : > { %v861_v20 = vadd.f32 %v1767_v19, %v2147_v22  ;;  %v852_v21 = vpop.f32.mrb[39].mxu1  ;;  %1797 = vmatmul.mubr.msk.bf16.gmra.mrb[32].mxu0 %vm686_vm2, %v937_v13  ;;  %v918_v24 = vmax.f32 %v858_v16, 0.0 }
 0x1f7   : > { %v853_v23 = vadd.f32 %v2147_v22, %v852_v21  ;;  %v916_v26 = vmax.f32 %v850_v18, 0.0 }
 0x1f8   : > { %v919_v25 = vmax.f32 %v861_v20, 0.0 }
 0x1f9   : > { %v917_v27 = vmax.f32 %v853_v23, 0.0 }
 0x1fa   : > { %v939_v28 = vpack.c.bf16 %v919_v25, %v918_v24 }
 0x1fb   : > { %v938_v29 = vpack.c.bf16 %v917_v27, %v916_v26  ;;  %v1770_v30 = vpop.f32.mrb[40].mxu1 }
 0x1fc   : > { %v874_v31 = vadd.f32 %v1770_v30, %v2147_v22  ;;  %v865_v32 = vpop.f32.mrb[41].mxu1 }
 0x1fd   : > { %v866_v33 = vadd.f32 %v2147_v22, %v865_v32  ;;  %v1771_v34 = vpop.f32.mrb[42].mxu1  ;;  %1800 = vmatprep.mubr.msk.bf16.mxu0 %vm686_vm2, %v938_v29 }
 0x1fe   : > { %v877_v35 = vadd.f32 %v1771_v34, %v2147_v22  ;;  %v868_v36 = vpop.f32.mrb[43].mxu1  ;;  %1801 = vmatmul.mubr.msk.bf16.gmra.mrb[36].mxu0 %vm686_vm2, %v939_v28  ;;  %v922_v38 = vmax.f32 %v874_v31, 0.0 }
 0x1ff   : > { %v869_v37 = vadd.f32 %v2147_v22, %v868_v36  ;;  %v920_v40 = vmax.f32 %v866_v33, 0.0 }
 0x200   : > { %v923_v39 = vmax.f32 %v877_v35, 0.0 }
 0x201   : > { %v921_v41 = vmax.f32 %v869_v37, 0.0 }
 0x202   : > { %v941_v42 = vpack.c.bf16 %v923_v39, %v922_v38 }
 0x203   : > { %v940_v43 = vpack.c.bf16 %v921_v41, %v920_v40  ;;  %v1774_v44 = vpop.f32.mrb[44].mxu1 }
 0x204   : > { %v890_v45 = vadd.f32 %v1774_v44, %v2147_v22  ;;  %v881_v46 = vpop.f32.mrb[45].mxu1 }
 0x205   : > { %v882_v47 = vadd.f32 %v2147_v22, %v881_v46  ;;  %v1775_v48 = vpop.f32.mrb[46].mxu1  ;;  %1804 = vmatprep.mubr.msk.bf16.mxu0 %vm686_vm2, %v940_v43 }
 0x206   : > { %v893_v49 = vadd.f32 %v1775_v48, %v2147_v22  ;;  %v884_v50 = vpop.f32.mrb[47].mxu1  ;;  %1805 = vmatmul.mubr.msk.bf16.gmra.mrb[40].mxu0 %vm686_vm2, %v941_v42  ;;  %v926_v52 = vmax.f32 %v890_v45, 0.0 }
 0x207   : > { %v885_v51 = vadd.f32 %v2147_v22, %v884_v50  ;;  %v924_v54 = vmax.f32 %v882_v47, 0.0 }
 0x208   : > { %v927_v53 = vmax.f32 %v893_v49, 0.0 }
 0x209   : > { %v925_v55 = vmax.f32 %v885_v51, 0.0 }
 0x20a   : > { %v943_v56 = vpack.c.bf16 %v927_v53, %v926_v52 }
 0x20b   : > { %v942_v57 = vpack.c.bf16 %v925_v55, %v924_v54 }
 0x20d   : > { %1808 = vmatprep.mubr.msk.bf16.mxu0 %vm686_vm2, %v942_v57 }
 0x20e   : > { %1809 = vmatmul.mubr.msk.bf16.gmra.mrb[44].mxu0 %vm686_vm2, %v943_v56 }
 0x2a9   : > { %v1782_v59 = vpop.f32.mrb[16].mxu0 }
 0x2aa   : > { %v1058_v60 = vadd.f32 %v1782_v59, %v2200_v58  ;;  %v1049_v61 = vpop.f32.mrb[17].mxu0 }
 0x2ab   : > { %v1050_v22 = vadd.f32 %v2200_v58, %v1049_v61  ;;  %v1783_v63 = vpop.f32.mrb[18].mxu0 }
 0x2ac   : > { %v1178_v0 = vmax.f32 %v1058_v60, 0.0  ;;  %v1061_v2 = vadd.f32 %v1783_v63, %v2200_v58  ;;  %v1052_v3 = vpop.f32.mrb[19].mxu0 }
 0x2ad   : > { %v1176_v4 = vmax.f32 %v1050_v22, 0.0  ;;  %v1053_v5 = vadd.f32 %v2200_v58, %v1052_v3 }
 0x2ae   : > { %v1179_v6 = vmax.f32 %v1061_v2, 0.0  ;;  %v1218_v8 = vsel %vm1208_vm3, %v1178_v0, -inf }
 0x2af   : > { %v1177_v7 = vmax.f32 %v1053_v5, 0.0  ;;  %v1209_v1 = vsel %vm1208_vm3, %v1176_v4, -inf }
 0x2b0   : > { %v1219_v9 = vsel %vm1208_vm3, %v1179_v6, -inf }
 0x2b1   : > { %v1220_v62 = vmax.f32 %v1218_v8, %v1219_v9  ;;  %v1210_v10 = vsel %vm1208_vm3, %v1177_v7, -inf  ;;  %v1786_v11 = vpop.f32.mrb[20].mxu0 }
 0x2b2   : > { %v1211_v12 = vmax.f32 %v1209_v1, %v1210_v10  ;;  %v1074_v13 = vadd.f32 %v1786_v11, %v2200_v58  ;;  %v1065_v14 = vpop.f32.mrb[21].mxu0 }
 0x2b3   : > { %v1221_v15 = vrot.slane %v1220_v62, 4  ;;  %v1066_v16 = vadd.f32 %v2200_v58, %v1065_v14  ;;  %v1787_v17 = vpop.f32.mrb[22].mxu0 }
 0x2b4   : > { %v1212_v18 = vrot.slane %v1211_v12, 4  ;;  %v1182_v19 = vmax.f32 %v1074_v13, 0.0  ;;  %v1077_v20 = vadd.f32 %v1787_v17, %v2200_v58  ;;  %v1068_v21 = vpop.f32.mrb[23].mxu0 }
 0x2b5   : > { %v1222_v23 = vmax.f32 %v1220_v62, %v1221_v15  ;;  %v1180_v24 = vmax.f32 %v1066_v16, 0.0  ;;  %v1069_v25 = vadd.f32 %v2200_v58, %v1068_v21 }
 0x2b6   : > { %v1213_v26 = vmax.f32 %v1211_v12, %v1212_v18  ;;  %v1183_v27 = vmax.f32 %v1077_v20, 0.0  ;;  %v1236_v31 = vsel %vm1208_vm3, %v1182_v19, -inf }
 0x2b7   : > { %v1223_v28 = vrot.slane %v1222_v23, 2  ;;  %v1181_v29 = vmax.f32 %v1069_v25, 0.0  ;;  %v1227_v34 = vsel %vm1208_vm3, %v1180_v24, -inf }
 0x2b8   : > { %v1214_v30 = vrot.slane %v1213_v26, 2  ;;  %v1237_v32 = vsel %vm1208_vm3, %v1183_v27, -inf }
 0x2b9   : > { %v1224_v33 = vmax.f32 %v1222_v23, %v1223_v28  ;;  %v1238_v35 = vmax.f32 %v1236_v31, %v1237_v32  ;;  %v1228_v36 = vsel %vm1208_vm3, %v1181_v29, -inf  ;;  %v1790_v37 = vpop.f32.mrb[24].mxu0 }
 0x2ba   : > { %v1215_v38 = vmax.f32 %v1213_v26, %v1214_v30  ;;  %v1229_v39 = vmax.f32 %v1227_v34, %v1228_v36  ;;  %v1090_v40 = vadd.f32 %v1790_v37, %v2200_v58  ;;  %v1081_v41 = vpop.f32.mrb[25].mxu0 }
 0x2bb   : > { %v1225_v42 = vrot.slane %v1224_v33, 1  ;;  %v1239_v43 = vrot.slane %v1238_v35, 4  ;;  %v1082_v44 = vadd.f32 %v2200_v58, %v1081_v41  ;;  %v1791_v45 = vpop.f32.mrb[26].mxu0 }
 0x2bc   : > { %v1216_v46 = vrot.slane %v1215_v38, 1  ;;  %v1230_v47 = vrot.slane %v1229_v39, 4  ;;  %v1186_v48 = vmax.f32 %v1090_v40, 0.0  ;;  %v1093_v49 = vadd.f32 %v1791_v45, %v2200_v58  ;;  %v1084_v50 = vpop.f32.mrb[27].mxu0 }
 0x2bd   : > { %v1226_v51 = vmax.f32 %v1224_v33, %v1225_v42  ;;  %v1240_v52 = vmax.f32 %v1238_v35, %v1239_v43  ;;  %v1184_v53 = vmax.f32 %v1082_v44, 0.0  ;;  %v1085_v54 = vadd.f32 %v2200_v58, %v1084_v50 }
 0x2be   : > { %v1217_v55 = vmax.f32 %v1215_v38, %v1216_v46  ;;  %v1231_v56 = vmax.f32 %v1229_v39, %v1230_v47  ;;  %v1187_v57 = vmax.f32 %v1093_v49, 0.0  ;;  %v1254_v61 = vsel %vm1208_vm3, %v1186_v48, -inf }
 0x2bf   : > { %v1637_v59 = vpack.c.bf16 %v1226_v51, %v1226_v51  ;;  %v1241_v60 = vrot.slane %v1240_v52, 2  ;;  %v1185_v22 = vmax.f32 %v1085_v54, 0.0  ;;  %v1245_v2 = vsel %vm1208_vm3, %v1184_v53, -inf }
 0x2c0   : > { %v1636_v63 = vpack.c.bf16 %v1217_v55, %v1217_v55  ;;  %v1232_v0 = vrot.slane %v1231_v56, 2  ;;  %v1255_v3 = vsel %vm1208_vm3, %v1187_v57, -inf }
 0x2c1   : > { %v1418_v4 = vunpack.c.l.b16 %v1637_v59  ;;  %v1242_v5 = vmax.f32 %v1240_v52, %v1241_v60  ;;  %v1256_v6 = vmax.f32 %v1254_v61, %v1255_v3  ;;  %v1246_v7 = vsel %vm1208_vm3, %v1185_v22, -inf  ;;  %v1794_v8 = vpop.f32.mrb[28].mxu0 }
 0x2c2   : > { %v1417_v9 = vunpack.c.l.b16 %v1636_v63  ;;  %v1233_v1 = vmax.f32 %v1231_v56, %v1232_v0  ;;  %v1247_v62 = vmax.f32 %v1245_v2, %v1246_v7  ;;  %v1106_v10 = vadd.f32 %v1794_v8, %v2200_v58  ;;  %v1097_v11 = vpop.f32.mrb[29].mxu0 }
 0x2c3   : > { %v1243_v12 = vrot.slane %v1242_v5, 1  ;;  %v1257_v13 = vrot.slane %v1256_v6, 4  ;;  %v1098_v14 = vadd.f32 %v2200_v58, %v1097_v11  ;;  %v1795_v15 = vpop.f32.mrb[30].mxu0 }
 0x2c4   : > { %v1434_v16 = vsel %vm1433_vm4, %v1418_v4, %v1417_v9  ;;  %v1234_v17 = vrot.slane %v1233_v1, 1  ;;  %v1248_v18 = vrot.slane %v1247_v62, 4  ;;  %v1190_v19 = vmax.f32 %v1106_v10, 0.0  ;;  %v1100_v20 = vpop.f32.mrb[31].mxu0 }
 0x2c5   : > { %v1244_v21 = vmax.f32 %v1242_v5, %v1243_v12  ;;  %v1258_v23 = vmax.f32 %v1256_v6, %v1257_v13  ;;  %v1188_v24 = vmax.f32 %v1098_v14, 0.0  ;;  %v1109_v25 = vadd.f32 %v1795_v15, %v2200_v58 }
 0x2c6   : > { %v1235_v26 = vmax.f32 %v1233_v1, %v1234_v17  ;;  %v1249_v27 = vmax.f32 %v1247_v62, %v1248_v18  ;;  %v1101_v28 = vadd.f32 %v2200_v58, %v1100_v20  ;;  %v1272_v34 = vsel %vm1208_vm3, %v1190_v19, -inf }
 0x2c7   : > { %v1639_v29 = vpack.c.bf16 %v1244_v21, %v1244_v21  ;;  %v1259_v30 = vrot.slane %v1258_v23, 2  ;;  %v1191_v31 = vmax.f32 %v1109_v25, 0.0  ;;  %v1263_v38 = vsel %vm1208_vm3, %v1188_v24, -inf }
 0x2c8   : > { %v1638_v32 = vpack.c.bf16 %v1235_v26, %v1235_v26  ;;  %v1250_v33 = vrot.slane %v1249_v27, 2  ;;  %v1189_v35 = vmax.f32 %v1101_v28, 0.0 }
 0x2c9   : > { %v1420_v36 = vunpack.c.l.b16 %v1639_v29  ;;  %v1260_v37 = vmax.f32 %v1258_v23, %v1259_v30  ;;  %v1273_v39 = vsel %vm1208_vm3, %v1191_v31, -inf  ;;  %v1798_v40 = vpop.f32.mrb[32].mxu0 }
 0x2ca   : > { %v1419_v41 = vunpack.c.l.b16 %v1638_v32  ;;  %v1251_v42 = vmax.f32 %v1249_v27, %v1250_v33  ;;  %v1274_v43 = vmax.f32 %v1272_v34, %v1273_v39  ;;  %v1264_v44 = vsel %vm1208_vm3, %v1189_v35, -inf  ;;  %v1113_v45 = vpop.f32.mrb[33].mxu0 }
 0x2cb   : > { %v1261_v46 = vrot.slane %v1260_v37, 1  ;;  %v1265_v47 = vmax.f32 %v1263_v38, %v1264_v44  ;;  %v1122_v48 = vadd.f32 %v1798_v40, %v2200_v58  ;;  %v1114_v49 = vadd.f32 %v2200_v58, %v1113_v45  ;;  %v1799_v50 = vpop.f32.mrb[34].mxu0 }
 0x2cc   : > { %v1436_v51 = vsel %vm1435_vm5, %v1419_v41, %v1434_v16  ;;  %v1252_v52 = vrot.slane %v1251_v42, 1  ;;  %v1275_v53 = vrot.slane %v1274_v43, 4  ;;  %v1125_v54 = vadd.f32 %v1799_v50, %v2200_v58  ;;  %v1116_v55 = vpop.f32.mrb[35].mxu0 }
 0x2cd   : > { %v1262_v56 = vmax.f32 %v1260_v37, %v1261_v46  ;;  %v1438_v57 = vsel %vm1437_vm6, %v1420_v36, %v1436_v51  ;;  %v1266_v59 = vrot.slane %v1265_v47, 4  ;;  %v1194_v60 = vmax.f32 %v1122_v48, 0.0 }
 0x2ce   : > { %v1253_v61 = vmax.f32 %v1251_v42, %v1252_v52  ;;  %v1276_v22 = vmax.f32 %v1274_v43, %v1275_v53  ;;  %v1192_v63 = vmax.f32 %v1114_v49, 0.0  ;;  %v1195_v0 = vmax.f32 %v1125_v54, 0.0 }
 0x2cf   : > { %v1641_v2 = vpack.c.bf16 %v1262_v56, %v1262_v56  ;;  %v1267_v3 = vmax.f32 %v1265_v47, %v1266_v59  ;;  %v1117_v4 = vadd.f32 %v2200_v58, %v1116_v55  ;;  %v1290_v7 = vsel %vm1208_vm3, %v1194_v60, -inf }
 0x2d0   : > { %v1640_v5 = vpack.c.bf16 %v1253_v61, %v1253_v61  ;;  %v1277_v6 = vrot.slane %v1276_v22, 2  ;;  %v1291_v8 = vsel %vm1208_vm3, %v1195_v0, -inf  ;;  %v1281_v1 = vsel %vm1208_vm3, %v1192_v63, -inf }
 0x2d1   : > { %v1268_v9 = vrot.slane %v1267_v3, 2  ;;  %v1292_v62 = vmax.f32 %v1290_v7, %v1291_v8  ;;  %v1193_v10 = vmax.f32 %v1117_v4, 0.0  ;;  %v1802_v11 = vpop.f32.mrb[36].mxu0  ;;  %v1422_v12 = vunpack.c.l.b16 %v1641_v2 }
 0x2d2   : > { %v1421_v13 = vunpack.c.l.b16 %v1640_v5  ;;  %v1278_v14 = vmax.f32 %v1276_v22, %v1277_v6  ;;  %v1138_v15 = vadd.f32 %v1802_v11, %v2200_v58  ;;  %v1129_v16 = vpop.f32.mrb[37].mxu0 }
 0x2d3   : > { %v1269_v17 = vmax.f32 %v1267_v3, %v1268_v9  ;;  %v1293_v18 = vrot.slane %v1292_v62, 4  ;;  %v1282_v19 = vsel %vm1208_vm3, %v1193_v10, -inf  ;;  %v1130_v20 = vadd.f32 %v2200_v58, %v1129_v16  ;;  %v1803_v21 = vpop.f32.mrb[38].mxu0 }
 0x2d4   : > { %v1440_v23 = vsel %vm1439_vm7, %v1421_v13, %v1438_v57  ;;  %v1279_v24 = vrot.slane %v1278_v14, 1  ;;  %v1283_v25 = vmax.f32 %v1281_v1, %v1282_v19  ;;  %v1198_v26 = vmax.f32 %v1138_v15, 0.0  ;;  %v1132_v27 = vpop.f32.mrb[39].mxu0 }
 0x2d5   : > { %v1270_v28 = vrot.slane %v1269_v17, 1  ;;  %v1442_v29 = vsel %vm1441_vm8, %v1422_v12, %v1440_v23  ;;  %v1294_v30 = vmax.f32 %v1292_v62, %v1293_v18  ;;  %v1196_v31 = vmax.f32 %v1130_v20, 0.0 }
 0x2d6   : > { %v1280_v32 = vmax.f32 %v1278_v14, %v1279_v24  ;;  %v1284_v33 = vrot.slane %v1283_v25, 4  ;;  %v1141_v34 = vadd.f32 %v1803_v21, %v2200_v58  ;;  %v1133_v37 = vadd.f32 %v2200_v58, %v1132_v27 }
 0x2d7   : > { %v1271_v35 = vmax.f32 %v1269_v17, %v1270_v28  ;;  %v1295_v36 = vrot.slane %v1294_v30, 2  ;;  %v1308_v39 = vsel %vm1208_vm3, %v1198_v26, -inf  ;;  %v1299_v43 = vsel %vm1208_vm3, %v1196_v31, -inf }
 0x2d8   : > { %v1285_v38 = vmax.f32 %v1283_v25, %v1284_v33  ;;  %v1199_v40 = vmax.f32 %v1141_v34, 0.0  ;;  %v1197_v44 = vmax.f32 %v1133_v37, 0.0  ;;  %v1643_v46 = vpack.c.bf16 %v1280_v32, %v1280_v32 }
 0x2d9   : > { %v1642_v41 = vpack.c.bf16 %v1271_v35, %v1271_v35  ;;  %v1296_v42 = vmax.f32 %v1294_v30, %v1295_v36  ;;  %v1806_v45 = vpop.f32.mrb[40].mxu0 }
 0x2da   : > { %v1286_v47 = vrot.slane %v1285_v38, 2  ;;  %v1309_v48 = vsel %vm1208_vm3, %v1199_v40, -inf  ;;  %v1154_v49 = vadd.f32 %v1806_v45, %v2200_v58  ;;  %v1145_v50 = vpop.f32.mrb[41].mxu0  ;;  %v1300_v54 = vsel %vm1208_vm3, %v1197_v44, -inf }
 0x2db   : > { %v1423_v51 = vunpack.c.l.b16 %v1642_v41  ;;  %v1297_v52 = vrot.slane %v1296_v42, 1  ;;  %v1310_v53 = vmax.f32 %v1308_v39, %v1309_v48  ;;  %v1807_v55 = vpop.f32.mrb[42].mxu0  ;;  %v1301_v57 = vmax.f32 %v1299_v43, %v1300_v54 }
 0x2dc   : > { %v1287_v56 = vmax.f32 %v1285_v38, %v1286_v47  ;;  %v1202_v59 = vmax.f32 %v1154_v49, 0.0  ;;  %v1146_v60 = vadd.f32 %v2200_v58, %v1145_v50  ;;  %v1148_v61 = vpop.f32.mrb[43].mxu0  ;;  %v1157_v2 = vadd.f32 %v1807_v55, %v2200_v58 }
 0x2dd   : > { %v1444_v22 = vsel %vm1443_vm9, %v1423_v51, %v1442_v29  ;;  %v1298_v63 = vmax.f32 %v1296_v42, %v1297_v52  ;;  %v1311_v0 = vrot.slane %v1310_v53, 4  ;;  %v1424_v3 = vunpack.c.l.b16 %v1643_v46 }
 0x2de   : > { %v1288_v4 = vrot.slane %v1287_v56, 1  ;;  %v1302_v5 = vrot.slane %v1301_v57, 4  ;;  %v1200_v6 = vmax.f32 %v1146_v60, 0.0  ;;  %v1203_v9 = vmax.f32 %v1157_v2, 0.0 }
 0x2df   : > { %v1645_v7 = vpack.c.bf16 %v1298_v63, %v1298_v63  ;;  %v1312_v8 = vmax.f32 %v1310_v53, %v1311_v0  ;;  %v1149_v1 = vadd.f32 %v2200_v58, %v1148_v61  ;;  %v1326_v11 = vsel %vm1208_vm3, %v1202_v59, -inf }
 0x2e0   : > { %v1289_v62 = vmax.f32 %v1287_v56, %v1288_v4  ;;  %v1303_v10 = vmax.f32 %v1301_v57, %v1302_v5  ;;  %v1446_v12 = vsel %vm1445_vm10, %v1424_v3, %v1444_v22  ;;  %v1327_v15 = vsel %vm1208_vm3, %v1203_v9, -inf }
 0x2e1   : > { %v1426_v13 = vunpack.c.l.b16 %v1645_v7  ;;  %v1313_v14 = vrot.slane %v1312_v8, 2  ;;  %v1201_v16 = vmax.f32 %v1149_v1, 0.0  ;;  %v1810_v17 = vpop.f32.mrb[44].mxu0  ;;  %v1328_v20 = vmax.f32 %v1326_v11, %v1327_v15 }
 0x2e2   : > { %v1644_v18 = vpack.c.bf16 %v1289_v62, %v1289_v62  ;;  %v1304_v19 = vrot.slane %v1303_v10, 2  ;;  %v1170_v21 = vadd.f32 %v1810_v17, %v2200_v58  ;;  %v1161_v23 = vpop.f32.mrb[45].mxu0  ;;  %v1317_v25 = vsel %vm1208_vm3, %v1200_v6, -inf }
 0x2e3   : > { %v1314_v24 = vmax.f32 %v1312_v8, %v1313_v14  ;;  %v1318_v26 = vsel %vm1208_vm3, %v1201_v16, -inf  ;;  %v1811_v27 = vpop.f32.mrb[46].mxu0  ;;  %v1454_v28 = vpack.c.b16 %v1446_v12, %v1446_v12  ;;  %v1329_v31 = vrot.slane %v1328_v20, 4 }
 0x2e4   : > { %v1425_v29 = vunpack.c.l.b16 %v1644_v18  ;;  %v1305_v30 = vmax.f32 %v1303_v10, %v1304_v19  ;;  %v1319_v32 = vmax.f32 %v1317_v25, %v1318_v26  ;;  %v1164_v33 = vpop.f32.mrb[47].mxu0  ;;  %v1206_v35 = vmax.f32 %v1170_v21, 0.0 }
 0x2e5   : > { %v1315_v34 = vrot.slane %v1314_v24, 1  ;;  %v1162_v36 = vadd.f32 %v2200_v58, %v1161_v23  ;;  %v1173_v37 = vadd.f32 %v1811_v27, %v2200_v58  ;;  %1459 = vst.msk [vmem:[%s2271_s22] sm:$0xf] %vm1458_vm11, %v1454_v28  ;;  %v1330_v40 = vmax.f32 %v1328_v20, %v1329_v31 }
 0x2e6   : > { %v1447_v38 = vsel %vm1433_vm4, %v1426_v13, %v1425_v29  ;;  %v1306_v39 = vrot.slane %v1305_v30, 1  ;;  %v1320_v41 = vrot.slane %v1319_v32, 4  ;;  %v1165_v47 = vadd.f32 %v2200_v58, %v1164_v33 }
 0x2e7   : > { %v1316_v42 = vmax.f32 %v1314_v24, %v1315_v34  ;;  %v1207_v43 = vmax.f32 %v1173_v37, 0.0  ;;  %v1331_v45 = vrot.slane %v1330_v40, 2  ;;  %v1344_v49 = vsel %vm1208_vm3, %v1206_v35, -inf }
 0x2e8   : > { %v1307_v44 = vmax.f32 %v1305_v30, %v1306_v39  ;;  %v1321_v46 = vmax.f32 %v1319_v32, %v1320_v41  ;;  %v1204_v50 = vmax.f32 %v1162_v36, 0.0  ;;  %v1205_v56 = vmax.f32 %v1165_v47, 0.0 }
 0x2e9   : > { %v1647_v48 = vpack.c.bf16 %v1316_v42, %v1316_v42  ;;  %v1345_v51 = vsel %vm1208_vm3, %v1207_v43, -inf  ;;  %v1332_v53 = vmax.f32 %v1330_v40, %v1331_v45 }
 0x2ea   : > { %v1646_v52 = vpack.c.bf16 %v1307_v44, %v1307_v44  ;;  %v1322_v54 = vrot.slane %v1321_v46, 2  ;;  %v1346_v55 = vmax.f32 %v1344_v49, %v1345_v51  ;;  %v1335_v63 = vsel %vm1208_vm3, %v1204_v50, -inf }
 0x2eb   : > { %v1333_v59 = vrot.slane %v1332_v53, 1  ;;  %v1428_v22 = vunpack.c.l.b16 %v1647_v48  ;;  %v1336_v58 = vsel %vm1208_vm3, %v1205_v56, -inf }
 0x2ec   : > { %v1427_v57 = vunpack.c.l.b16 %v1646_v52  ;;  %v1323_v60 = vmax.f32 %v1321_v46, %v1322_v54  ;;  %v1347_v61 = vrot.slane %v1346_v55, 4  ;;  %v1337_v6 = vmax.f32 %v1335_v63, %v1336_v58 }
 0x2ed   : > { %v1334_v2 = vmax.f32 %v1332_v53, %v1333_v59 }
 0x2ee   : > { %v1448_v0 = vsel %vm1435_vm5, %v1427_v57, %v1447_v38  ;;  %v1324_v3 = vrot.slane %v1323_v60, 1  ;;  %v1348_v4 = vmax.f32 %v1346_v55, %v1347_v61  ;;  %v1338_v1 = vrot.slane %v1337_v6, 4 }
 0x2ef   : > { %v1449_v5 = vsel %vm1437_vm6, %v1428_v22, %v1448_v0  ;;  %v1649_v9 = vpack.c.bf16 %v1334_v2, %v1334_v2 }
 0x2f0   : > { %v1325_v7 = vmax.f32 %v1323_v60, %v1324_v3  ;;  %v1349_v8 = vrot.slane %v1348_v4, 2  ;;  %v1339_v11 = vmax.f32 %v1337_v6, %v1338_v1 }
 0x2f1   : > { %v1430_v14 = vunpack.c.l.b16 %v1649_v9 }
 0x2f2   : > { %v1648_v62 = vpack.c.bf16 %v1325_v7, %v1325_v7  ;;  %v1350_v10 = vmax.f32 %v1348_v4, %v1349_v8  ;;  %v1340_v15 = vrot.slane %v1339_v11, 2 }
 0x2f4   : > { %v1429_v12 = vunpack.c.l.b16 %v1648_v62  ;;  %v1351_v13 = vrot.slane %v1350_v10, 1  ;;  %v1341_v17 = vmax.f32 %v1339_v11, %v1340_v15 }
 0x2f6   : > { %v1450_v16 = vsel %vm1439_vm7, %v1429_v12, %v1449_v5  ;;  %v1352_v19 = vmax.f32 %v1350_v10, %v1351_v13  ;;  %v1342_v20 = vrot.slane %v1341_v17, 1 }
 0x2f7   : > { %v1451_v18 = vsel %vm1441_vm8, %v1430_v14, %v1450_v16 }
 0x2f8   : > { %v1343_v21 = vmax.f32 %v1341_v17, %v1342_v20  ;;  %v1651_v23 = vpack.c.bf16 %v1352_v19, %v1352_v19 }
 0x2fa   : > { %v1650_v24 = vpack.c.bf16 %v1343_v21, %v1343_v21  ;;  %v1432_v26 = vunpack.c.l.b16 %v1651_v23 }
 0x2fc   : > { %v1431_v25 = vunpack.c.l.b16 %v1650_v24 }
 0x2fe   : > { %v1452_v27 = vsel %vm1443_vm9, %v1431_v25, %v1451_v18 }
 0x2ff   : > { %v1453_v28 = vsel %vm1445_vm10, %v1432_v26, %v1452_v27 }
 0x300   : > { %v1455_v29 = vpack.c.b16 %v1453_v28, %v1453_v28 }
 0x302   : > { %1460 = vst.msk [vmem:[%s2271_s22 + $0x4] sm:$0xf] %vm1458_vm11, %v1455_v29 }
 0x303   : > { %1890 = shalt.err (!%p1887_p3)
}
 0x304   : > { %s1891_s18 = scalar_lea.hbm %s2292_s13, 128  ;;  %s1895_s21 = scalar_lea.hbm %s2348_s7, 256 }
 0x305   : > { %p1892_p4 = scmp.ne.s32.totalorder %s2292_s13, %s1891_s18  ;;  %p1896_p9 = scmp.lt.u32.totalorder %s2292_s13, %s2348_s7 }
 0x306   : > { %p1897_p10 = scmp.lt.u32.totalorder %s1895_s21, %s1891_s18  ;;  %p1899_p12 = scmp.lt.u32.totalorder %s1891_s18, %s2292_s13 }
 0x307   : > { %p1893_p7 = pnand %p1892_p4, %p2022_p5 }
 0x308   : > { %p1898_p11 = por %p1897_p10, %p1896_p9 }
 0x309   : > { %p1894_p8 = pneg %p1893_p7 }
 0x30a   : > { %p1900_p13 = por %p1899_p12, %p1898_p11 }
 0x30c   : > { %p1901_p0 = pnand %p1900_p13, %p1894_p8 }
 0x30e   : > { %1904 = shalt.err (!%p1901_p0)
}
 0x30f   : > { %s1942_s8 = smov 64   ;;  %s1943_s9 = smov 4  }
 0x310   : > { %1816 = dma.vmem_to_hbm [thread:$0]  (%p2022_p5), %s2294_s29, 128, %s2292_s13, %s2300_s28, %s1942_s8, %s1942_s8, %s1943_s9  }
 0x311 PF: > { %p1822_p1 = scmp.ge.s32.totalorder %s1939_s27, 2  ;;  %s1490_s14 = sand.u32 1, %s1927_s24  }
 0x312   : > { %s1491_s15 = scalar_lea.sflag [#allocation3], %s1490_s14 }
 0x313   : > { %p1819_p2 = pnand %p1822_p1, %p2026_p6 }
 0x315   : > { %1922 = dma.done.wait (!%p1819_p2), %s1491_s15, 128  }
 0x316   : > { %1924 = vsyncadd (!%p1819_p2), %s1491_s15, 4294967168  ;;  %p17_p3 = scmp.ge.s32.totalorder %s2009_s30, 4   ;;  %s2351_s24 = smov %s1931_s25 }
 0x317   : > { %s2352_s25 = smov %s1935_s26  ;;  %s2353_s26 = smov %s2020_s10 }
 0x318   : > { %s2354_s27 = smov %s2009_s30  ;;  %19 = sbr.rel (!%p17_p3) target bundleno = 3 (0x3), region = 83 }
 0x31f   :  { %1496 = vsyncpa [#allocation3], 1 }
 0x320   :  { %1498 = vsyncpa [#allocation3 + $0x1], 1 }

</bundles_post_ra>
